<compile_context>
chip_gen: v7x
topology: tpu7x:2x2x1
jax: 0.10.0
libtpu: 0.0.40
codegen_flags: <defaults>
</compile_context>

<pallas_src>
import functools

import numpy as np
import jax
import jax.numpy as jnp
from jax.experimental import pallas as pl
from jax.experimental.pallas import tpu as pltpu


def make_position_encoding_table(d_model, max_seq_len, dtype=jnp.float32):
    """Build the (max_seq_len + 1, d_model) table exactly like the PyTorch ctor."""
    pos = np.arange(max_seq_len, dtype=np.float64)[:, None]
    j = np.arange(d_model, dtype=np.float64)[None, :]
    angle = pos / np.power(10000.0, 2.0 * np.floor(j / 2.0) / d_model)
    pe = np.zeros((max_seq_len, d_model), dtype=np.float64)
    pe[:, 0::2] = np.sin(angle[:, 0::2])
    pe[:, 1::2] = np.cos(angle[:, 1::2])
    table = np.concatenate([np.zeros((1, d_model)), pe], axis=0)  # row 0 = pad
    return jnp.asarray(table, dtype=dtype)


def _pos_enc_kernel(len_ref, pe_ref, o_ref, *, d_model, tl):
    # len_ref: (TB, 1) int32  per-sample sequence lengths
    # pe_ref : (1, TL)        flattened sinusoidal slab tile
    #                         (flat index i = t * d_model + c)
    # o_ref  : (TB, TL)       flattened, lane-dense output tile
    #
    # Prefix mask in flat space: out[b, i] = pe_flat[i] iff i < len_b * d_model.
    col0 = pl.program_id(1) * tl
    flat_idx = col0 + jax.lax.broadcasted_iota(jnp.int32, (1, tl), 1)  # (1, TL)
    thresh = len_ref[...] * d_model                                    # (TB, 1)
    mask = flat_idx < thresh                                           # (TB, TL)
    pe = pe_ref[...]                                                   # (1, TL)
    o_ref[...] = jnp.where(mask, pe, jnp.zeros_like(pe)).astype(o_ref.dtype)


def _pick_tiles(B, L, itemsize, target_bytes=4 << 20):
    """Choose (TB, TL) output tiles.

    Goals: blocks big enough to amortize the ~0.35us/grid-step overhead and hit
    the HBM-write roofline, sublane-aligned TB and lane-aligned TL that divide
    (B, L) exactly, and 2*(TB*TL + TL + TB)*itemsize comfortably below the
    16 MiB v5e scoped-VMEM default so the same tiling works on v5e/v6e/v7x
    without any compiler flags.
    """
    if B * L * itemsize <= target_bytes:
        return B, L                       # whole problem fits in one/few blocks
    # Batch tile: a multiple-of-8 divisor of B (keeps stores sublane-aligned).
    tb = B
    for t in range(8, B, 8):
        if B % t == 0:
            tb = t
            if t * L * itemsize >= (512 << 10):
                break                     # block already big enough
    # Sequence tile: largest multiple-of-128 divisor of L whose block fits.
    tl = L
    if tb * L * itemsize > target_bytes:
        for t in range(128, L, 128):
            if L % t == 0 and tb * t * itemsize <= target_bytes:
                tl = t                    # ascending -> ends at the largest fit
    return tb, tl


def positional_encoding(table, input_len, category_num, *,
                        out_dtype=None, seq_len_multiple=1):
    """Forward pass of PositionalEncoding.

    table:           (max_seq_len + 1, d_model) from make_position_encoding_table
    input_len:       host-side int sequence of shape [B] (concrete, like PyTorch)
    category_num:    python int
    out_dtype:       optional narrower output dtype (e.g. jnp.bfloat16) to halve
                     HBM write traffic of this store-bound kernel
    seq_len_multiple:bucket max_len up to a multiple of this (cuts recompiles
                     when max(input_len) varies; keeps the flattened lane dim
                     a multiple of 128 when d_model*multiple % 128 == 0).
    returns:         (B, max_len, d_model), max_len = max(input_len) + category_num
    """
    input_len = np.asarray(input_len)
    if input_len.ndim != 1:
        raise ValueError("input_len must be a 1-D sequence of lengths")
    B = int(input_len.shape[0])
    max_seq_len = int(table.shape[0]) - 1
    d_model = int(table.shape[1])
    if int(input_len.max()) > max_seq_len:
        # PyTorch's nn.Embedding would raise index-out-of-range here.
        raise ValueError("input_len exceeds max_seq_len of the encoding table")

    max_len = int(input_len.max()) + int(category_num)   # host-side, static
    m = max(1, int(seq_len_multiple))
    padded_len = -(-max_len // m) * m                     # bucketed sequence length
    L = padded_len * d_model
    out_dtype = table.dtype if out_dtype is None else jnp.dtype(out_dtype)

    # Rows 1..padded_len of the table = encodings for positions 0..padded_len-1.
    # Rows past the table (category / bucket padding) are always masked to zero.
    rows = min(padded_len, max_seq_len)
    pe_slab = table[1:rows + 1]
    if rows < padded_len:
        pad = jnp.zeros((padded_len - rows, d_model), table.dtype)
        pe_slab = jnp.concatenate([pe_slab, pad], axis=0)
    pe_flat = pe_slab.reshape(1, L)                       # lane-dense slab

    lens = jnp.asarray(input_len, dtype=jnp.int32).reshape(B, 1)

    TB, TL = _pick_tiles(B, L, jnp.dtype(out_dtype).itemsize)

    kernel = functools.partial(_pos_enc_kernel, d_model=d_model, tl=TL)
    out_flat = pl.pallas_call(
        kernel,
        out_shape=jax.ShapeDtypeStruct((B, L), out_dtype),
        grid=(B // TB, L // TL),
        in_specs=[
            pl.BlockSpec((TB, 1), lambda i, j: (i, 0)),   # per-sample lengths
            pl.BlockSpec((1, TL), lambda i, j: (0, j)),   # PE slab tile
        ],
        out_specs=pl.BlockSpec((TB, TL), lambda i, j: (i, j)),
        compiler_params=pltpu.CompilerParams(
            dimension_semantics=("parallel", "parallel")),  # 2 axes for v7x TCs
    )(lens, pe_flat)

    out = out_flat.reshape(B, padded_len, d_model)        # free (contiguous)
    if padded_len != max_len:
        out = out[:, :max_len, :]
    return out


def positional_encoding_ref(table, input_len, category_num):
    """Pure-numpy/JAX reference implementing the PyTorch forward literally."""
    input_len = np.asarray(input_len)
    max_len = int(input_len.max()) + int(category_num)
    t = np.arange(max_len)
    input_pos = np.where(t[None, :] < input_len[:, None], t[None, :] + 1, 0)
    return jnp.asarray(np.asarray(table)[input_pos])


if __name__ == "__main__":
    d_model = 32
    max_seq_len = 16
    category_num = 2
    batch = 4

    table = make_position_encoding_table(d_model, max_seq_len)

    key = jax.random.PRNGKey(0)
    input_len = jax.random.randint(key, (batch,), 1, max_seq_len + 1,
                                   dtype=jnp.int32)
    input_len_host = np.asarray(jax.device_get(input_len))

    ref = positional_encoding_ref(table, input_len_host, category_num)

    # Default path (exact max_len).
    out = positional_encoding(table, input_len_host, category_num)
    out = jax.block_until_ready(out)
    assert out.shape == ref.shape, (out.shape, ref.shape)
    assert jnp.allclose(out, ref, atol=1e-6, rtol=1e-6), "mismatch vs reference"

    # Bucketed path (multiple-of-8 sequence length -> lane-dense L, fewer
    # recompiles when max(input_len) varies call-to-call).
    out_b = positional_encoding(table, input_len_host, category_num,
                                seq_len_multiple=8)
    out_b = jax.block_until_ready(out_b)
    assert out_b.shape == ref.shape, (out_b.shape, ref.shape)
    assert jnp.allclose(out_b, ref, atol=1e-6, rtol=1e-6), "bucketed mismatch"

    print("KERNEL_OK")
</pallas_src>

<mosaic_0001>
module attributes {stable_mosaic.version = 11 : i64} {
  func.func @_pos_enc_kernel(%arg0: i32, %arg1: i32, %arg2: memref<4x1xi32, #tpu.memory_space<vmem>>, %arg3: memref<1x512xf32, #tpu.memory_space<vmem>>, %arg4: memref<4x512xf32, #tpu.memory_space<vmem>>) attributes {dimension_semantics = [#tpu.dimension_semantics<parallel>, #tpu.dimension_semantics<parallel>], iteration_bounds = array<i64: 1, 1>, scalar_prefetch = 0 : i64, scratch_operands = 0 : i64, tpu.core_type = #tpu.core_type<tc>, window_params = [{transform_indices = @transform_0, window_bounds = array<i64: 4, 1>}, {transform_indices = @transform_1, window_bounds = array<i64: 1, 512>}, {transform_indices = @transform_2, window_bounds = array<i64: 4, 512>}]} {
    %c512_i32 = arith.constant 512 : i32
    %0 = arith.muli %arg1, %c512_i32 : i32
    %1 = tpu.iota {dimensions = array<i32: 1>} : vector<1x512xi32>
    %2 = vector.broadcast %0 : i32 to vector<1x512xi32>
    %3 = arith.addi %2, %1 : vector<1x512xi32>
    %c0 = arith.constant 0 : index
    %c0_0 = arith.constant 0 : index
    %4 = vector.load %arg2[%c0, %c0_0] : memref<4x1xi32, #tpu.memory_space<vmem>>, vector<4x1xi32>
    %c32_i32 = arith.constant 32 : i32
    %5 = vector.broadcast %c32_i32 : i32 to vector<4x1xi32>
    %6 = arith.muli %4, %5 : vector<4x1xi32>
    %7 = vector.broadcast %3 : vector<1x512xi32> to vector<4x512xi32>
    %8 = vector.broadcast %6 : vector<4x1xi32> to vector<4x512xi32>
    %9 = arith.cmpi slt, %7, %8 : vector<4x512xi32>
    %c0_1 = arith.constant 0 : index
    %c0_2 = arith.constant 0 : index
    %10 = vector.load %arg3[%c0_1, %c0_2] : memref<1x512xf32, #tpu.memory_space<vmem>>, vector<1x512xf32>
    %cst = arith.constant 0.000000e+00 : f32
    %11 = vector.broadcast %cst : f32 to vector<1x512xf32>
    %12 = vector.shape_cast %10 : vector<1x512xf32> to vector<1x512xf32>
    %13 = vector.broadcast %12 : vector<1x512xf32> to vector<4x512xf32>
    %14 = vector.shape_cast %11 : vector<1x512xf32> to vector<1x512xf32>
    %15 = vector.broadcast %14 : vector<1x512xf32> to vector<4x512xf32>
    %16 = arith.select %9, %13, %15 : vector<4x512xi1>, vector<4x512xf32>
    %c0_3 = arith.constant 0 : index
    %c0_4 = arith.constant 0 : index
    %17 = vector.load %arg4[%c0_3, %c0_4] : memref<4x512xf32, #tpu.memory_space<vmem>>, vector<4x512xf32>
    tpu.vector_store %arg4[%c0_3, %c0_4], %16 {strides = array<i32>} : memref<4x512xf32, #tpu.memory_space<vmem>>, vector<4x512xf32>,
    return
  }
  func.func @transform_0(%arg0: i32, %arg1: i32) -> (i32, i32) {
    %c0_i32 = arith.constant 0 : i32
    %c0_i32_0 = arith.constant 0 : i32
    return %arg0, %c0_i32 : i32, i32
  }
  func.func @transform_1(%arg0: i32, %arg1: i32) -> (i32, i32) {
    %c0_i32 = arith.constant 0 : i32
    %c0_i32_0 = arith.constant 0 : i32
    return %c0_i32, %arg1 : i32, i32
  }
  func.func @transform_2(%arg0: i32, %arg1: i32) -> (i32, i32) {
    %c0_i32 = arith.constant 0 : i32
    return %arg0, %arg1 : i32, i32
  }
}

</mosaic_0001>

<bundles_post_ra>
// kernel: tpu_custom_call.1
= control target key start
LH: loop header
LB: loop body
LE: loop exit
PB: predicated region body
PF: predicated region fallthrough
CT: control target
= control target key end

     0   :  { %v109_v1 = vmov 0   ;;  %s144_s0 = inlined_call_operand.vmem [shape: s32[4,1], index: 0, kind: input, shape index: {}]   ;;  %s145_s1 = inlined_call_operand.vmem [shape: f32[1,512], index: 1, kind: input, shape index: {}]   ;;  %s146_s2 = inlined_call_operand.hbm [shape: f32[4,512], index: 2, kind: output, shape index: {}]  }
   0x1   :  { %v23_v0 = vld [vmem:[%s144_s0] sm:$0xf]  ;;  %84 = vset.pattern.permute.xlu0 %v109_v1 }
   0x2   :  { %v24_v2 = vmul.u32 32, %v23_v0 }
   0x3   :  { %7 = vsyncpa [#allocation3], 0  ;;  %v13_v3 = vlaneseq  ;;  %v32_v10 = vld [vmem:[%s145_s1] sm:$0xf]  ;;  %s110_s0 = smov [#allocation2]  }
   0x4   :  { %26 = vperm.xlu0 %84, %v24_v2   ;;  %s74_s13 = sshll.u32 %s110_s0, 4  ;;  %s75_s13 = int_to_ptr.vmem [resolvable:$true] %s74_s13 }
   0x5   :  { %v35_v4 = vshrl.u32 %v13_v3, 7  ;;  %v14_v5 = vand.u32 127, %v13_v3  ;;  %s85_s1 = scalar_lea.vmem %s75_s13, 256  ;;  %p90_p1 = scmp.lt.s32.totalorder %s75_s13, %s75_s13 }
   0x6   :  { %p86_p0 = scmp.ne.s32.totalorder %s75_s13, %s85_s1  ;;  %p91_p2 = scmp.lt.s32.totalorder %s85_s1, %s85_s1 }
   0x7   :  { %v36_v6 = vsub.s32 0, %v35_v4  ;;  %v40_v7 = vsub.s32 1, %v35_v4  ;;  %v44_v8 = vsub.s32 2, %v35_v4  ;;  %v48_v9 = vsub.s32 3, %v35_v4 }
   0x8   :  { %v15_v11 = vadd.s32 128, %v14_v5  ;;  %v16_v12 = vadd.s32 256, %v14_v5  ;;  %v17_v13 = vadd.s32 384, %v14_v5  ;;  %p92_p3 = por %p91_p2, %p90_p1 }
   0x9   :  { %v37_v14 = vrot.slane %v32_v10, %v36_v6  ;;  %v41_v15 = vrot.slane %v32_v10, %v40_v7  ;;  %v45_v16 = vrot.slane %v32_v10, %v44_v8  ;;  %v49_v17 = vrot.slane %v32_v10, %v48_v9 }
   0xa   :  { %p93_p4 = pnand %p92_p3, %p86_p0 }
  0x83   :  { %v27_v18 = vpop.permute.xlu0 %26 }
  0x84   :  { %vm28_vm0 = vcmp.lt.s32.totalorder %v14_v5, %v27_v18  ;;  %vm29_vm1 = vcmp.lt.s32.totalorder %v15_v11, %v27_v18  ;;  %vm30_vm2 = vcmp.lt.s32.totalorder %v16_v12, %v27_v18  ;;  %vm31_vm3 = vcmp.lt.s32.totalorder %v17_v13, %v27_v18 }
  0x85   :  { %v54_v19 = vsel %vm28_vm0, %v37_v14, 0.0  ;;  %v55_v20 = vsel %vm29_vm1, %v41_v15, 0.0  ;;  %v56_v21 = vsel %vm30_vm2, %v45_v16, 0.0  ;;  %v57_v22 = vsel %vm31_vm3, %v49_v17, 0.0 }
  0x86   :  { %v62_v23 = vcombine.low %v54_v19, %v55_v20  ;;  %v63_v24 = vcombine.low %v56_v21, %v57_v22 }
  0x88   :  { %66 = vst [vmem:[#allocation2] sm:$0xff] %v62_v23  ;;  %67 = vst [vmem:[#allocation2 + $0x8] sm:$0xff] %v63_v24 }
  0x89   :  { %96 = shalt.err (!%p93_p4)
}
  0x8a   :  { %s97_s16 = scalar_lea.hbm %s146_s2, 256 }
  0x8b   :  { %p98_p5 = scmp.ne.s32.totalorder %s146_s2, %s97_s16  ;;  %p101_p6 = scmp.lt.u32.totalorder %s97_s16, %s146_s2 }
  0x8d   :  { %p103_p7 = pnand %p101_p6, %p98_p5 }
  0x8f   :  { %106 = shalt.err (!%p103_p7)
}
  0x90   :  { %77 = dma.vmem_to_hbm [thread:$0]  %s75_s13, 256, %s146_s2, [#allocation3]  }
  0x91   :  { %107 = dma.done.wait [#allocation3], 256  }
  0x92   :  { %108 = vsyncadd [#allocation3], 4294967040 }
  0x93   :  { %81 = vsyncpa [#allocation3], 1 }

</bundles_post_ra>
